<compile_context>
chip_gen: v6e
topology: v6e:2x2x1
jax: 0.10.0
libtpu: 0.0.40
codegen_flags: <defaults>
</compile_context>

<pallas_src>
import functools

import jax
import jax.numpy as jnp
from jax.experimental import pallas as pl
from jax.experimental.pallas import tpu as pltpu


TB = 8  # batch tile (multiple of 8 sublanes)


def _const_spec(shape):
    """Full-array block with a constant index map (stays VMEM-resident)."""
    nd = len(shape)
    return pl.BlockSpec(shape, lambda i: (0,) * nd)


# --------------------------- fused Generator kernel --------------------------
# Per batch tile of TB rows:
#   Net_0 : h0 = relu(z @ W0 + b0) ; out0 = tanh(h0 @ W1 + b1)        (TB, P0*3)
#   Net_1 : base = relu(out0 @ Wf + z @ Wz + bh)                      (TB, H1)
#           (z2 == z replicated over K  ->  z @ Wz computed once)
#           h1   = broadcast base over K, flattened to (TB*K, H1)
#           out1 = tanh(h1 @ W2 + b2)                                 (TB*K, P1*3)
def _generator_kernel(z_ref, w0_ref, b0_ref, w1_ref, b1_ref,
                      wf_ref, wz_ref, bh_ref, w2_ref, b2_ref,
                      out0_ref, out1_ref):
    tb = z_ref.shape[0]
    k = out1_ref.shape[0] // tb
    h1_dim = wz_ref.shape[1]

    # ------------------------------ Net_0 -----------------------------------
    z = z_ref[...]                                               # (TB, N) bf16
    h0 = jnp.dot(z, w0_ref[...], preferred_element_type=jnp.float32)
    h0 = jnp.maximum(h0 + b0_ref[...], 0.0)                      # (TB, H0) f32
    y0 = jnp.dot(h0.astype(jnp.bfloat16), w1_ref[...],
                 preferred_element_type=jnp.float32)
    out0 = jnp.tanh(y0 + b1_ref[...])                            # (TB, P0*3) f32
    out0_ref[...] = out0.astype(out0_ref.dtype)

    # ------------------------------ Net_1 -----------------------------------
    feat = out0.astype(jnp.bfloat16)                             # coarse cloud, flat
    fp = jnp.dot(feat, wf_ref[...], preferred_element_type=jnp.float32)
    zp = jnp.dot(z, wz_ref[...], preferred_element_type=jnp.float32)  # once, not K times
    base = jnp.maximum(fp + zp + bh_ref[...], 0.0)               # (TB, H1) f32
    # replicate over the K patches and collapse to one lane-dense 2-D matmul
    h1 = jnp.broadcast_to(base[:, None, :], (tb, k, h1_dim))
    h1 = h1.reshape(tb * k, h1_dim).astype(jnp.bfloat16)         # (TB*K, H1)
    y1 = jnp.dot(h1, w2_ref[...], preferred_element_type=jnp.float32)
    out1_ref[...] = jnp.tanh(y1 + b2_ref[...]).astype(out1_ref.dtype)


@functools.partial(jax.jit, static_argnames=("K",))
def generator_forward(z, net0_p, net1_p, K):
    B, N = z.shape
    B_pad = ((B + TB - 1) // TB) * TB
    if B_pad != B:
        z = jnp.pad(z, ((0, B_pad - B), (0, 0)))
    zb = z.astype(jnp.bfloat16)

    D0 = net0_p["w1"].shape[1]          # P0 * 3   (multiple of 128)
    D1 = net1_p["w2"].shape[1]          # P1 * 3   (multiple of 128)

    out0_flat, out1_flat = pl.pallas_call(
        _generator_kernel,
        out_shape=(jax.ShapeDtypeStruct((B_pad, D0), jnp.float32),
                   jax.ShapeDtypeStruct((B_pad * K, D1), jnp.float32)),
        grid=(B_pad // TB,),
        in_specs=[
            pl.BlockSpec((TB, N), lambda i: (i, 0)),   # activation tile
            _const_spec(net0_p["w0"].shape),           # weights: VMEM-resident
            _const_spec(net0_p["b0"].shape),
            _const_spec(net0_p["w1"].shape),
            _const_spec(net0_p["b1"].shape),
            _const_spec(net1_p["wf"].shape),
            _const_spec(net1_p["wz"].shape),
            _const_spec(net1_p["b1"].shape),
            _const_spec(net1_p["w2"].shape),
            _const_spec(net1_p["b2"].shape),
        ],
        out_specs=(pl.BlockSpec((TB, D0), lambda i: (i, 0)),
                   pl.BlockSpec((TB * K, D1), lambda i: (i, 0))),
        compiler_params=pltpu.CompilerParams(
            dimension_semantics=("parallel",)),
    )(zb, net0_p["w0"], net0_p["b0"], net0_p["w1"], net0_p["b1"],
      net1_p["wf"], net1_p["wz"], net1_p["b1"], net1_p["w2"], net1_p["b2"])

    # cheap reshapes to (..., 3) outside the kernel hot path
    out0 = out0_flat[:B].reshape(B, D0 // 3, 3)
    out1 = out1_flat.reshape(B_pad, K * (D1 // 3), 3)[:B]
    return out0, out1


# ------------------------------- Generator -----------------------------------
class Generator:
    """JAX/Pallas port of the PyTorch Generator orchestration."""

    def __init__(self, net0_params, net1_params, K=32):
        self.pointcloud = None
        self.K = K
        self.net0_params = net0_params
        self.net1_params = net1_params
        self.pc_0 = None
        self.pc_1 = None

    def forward(self, z):
        output_0, output_1 = generator_forward(
            z, self.net0_params, self.net1_params, self.K)
        self.pc_0 = output_0
        self.pc_1 = output_1
        return (output_0, output_1)

    def get_pcs(self):
        return (self.pc_0[-1], self.pc_1[-1])


def init_params(key, N=128, H0=128, P0=128, H1=128, P1=128):
    """Synthetic Net_0 / Net_1 parameters. Feature dims are 128-multiples so
    every matmul and every output slab is lane-dense. Weights bf16, biases f32."""
    ks = jax.random.split(key, 5)
    s = 0.1
    net0 = {
        "w0": (s * jax.random.normal(ks[0], (N, H0), jnp.float32)).astype(jnp.bfloat16),
        "b0": jnp.zeros((1, H0), jnp.float32),
        "w1": (s * jax.random.normal(ks[1], (H0, P0 * 3), jnp.float32)).astype(jnp.bfloat16),
        "b1": jnp.zeros((1, P0 * 3), jnp.float32),
    }
    net1 = {
        "wf": (s * jax.random.normal(ks[2], (P0 * 3, H1), jnp.float32)).astype(jnp.bfloat16),
        "wz": (s * jax.random.normal(ks[3], (N, H1), jnp.float32)).astype(jnp.bfloat16),
        "b1": jnp.zeros((1, H1), jnp.float32),
        "w2": (s * jax.random.normal(ks[4], (H1, P1 * 3), jnp.float32)).astype(jnp.bfloat16),
        "b2": jnp.zeros((1, P1 * 3), jnp.float32),
    }
    return net0, net1


if __name__ == "__main__":
    B, N, K = 16, 128, 8
    P0, P1 = 128, 128

    key = jax.random.PRNGKey(0)
    kz, kp = jax.random.split(key)

    net0_params, net1_params = init_params(kp, N=N, P0=P0, P1=P1)
    gen = Generator(net0_params, net1_params, K=K)

    z = jax.random.normal(kz, (B, N), jnp.float32)
    out0, out1 = gen.forward(z)
    out0 = jax.block_until_ready(out0)
    out1 = jax.block_until_ready(out1)

    assert out0.shape == (B, P0, 3), out0.shape
    assert out1.shape == (B, K * P1, 3), out1.shape
    assert bool(jnp.all(jnp.isfinite(out0))) and bool(jnp.all(jnp.isfinite(out1)))
    print("KERNEL_OK")
</pallas_src>

<mosaic_0001>
module attributes {stable_mosaic.version = 11 : i64} {
  func.func @_generator_kernel(%arg0: i32, %arg1: memref<8x128xbf16, #tpu.memory_space<vmem>>, %arg2: memref<128x128xbf16, #tpu.memory_space<vmem>>, %arg3: memref<1x128xf32, #tpu.memory_space<vmem>>, %arg4: memref<128x384xbf16, #tpu.memory_space<vmem>>, %arg5: memref<1x384xf32, #tpu.memory_space<vmem>>, %arg6: memref<384x128xbf16, #tpu.memory_space<vmem>>, %arg7: memref<128x128xbf16, #tpu.memory_space<vmem>>, %arg8: memref<1x128xf32, #tpu.memory_space<vmem>>, %arg9: memref<128x384xbf16, #tpu.memory_space<vmem>>, %arg10: memref<1x384xf32, #tpu.memory_space<vmem>>, %arg11: memref<8x384xf32, #tpu.memory_space<vmem>>, %arg12: memref<64x384xf32, #tpu.memory_space<vmem>>) attributes {dimension_semantics = [#tpu.dimension_semantics<parallel>], iteration_bounds = array<i64: 2>, scalar_prefetch = 0 : i64, scratch_operands = 0 : i64, tpu.core_type = #tpu.core_type<tc>, window_params = [{transform_indices = @transform_0, window_bounds = array<i64: 8, 128>}, {pipeline_mode = #tpu.pipeline_mode<synchronous>, transform_indices = @transform_1, window_bounds = array<i64: 128, 128>}, {pipeline_mode = #tpu.pipeline_mode<synchronous>, transform_indices = @transform_2, window_bounds = array<i64: 1, 128>}, {pipeline_mode = #tpu.pipeline_mode<synchronous>, transform_indices = @transform_3, window_bounds = array<i64: 128, 384>}, {pipeline_mode = #tpu.pipeline_mode<synchronous>, transform_indices = @transform_4, window_bounds = array<i64: 1, 384>}, {pipeline_mode = #tpu.pipeline_mode<synchronous>, transform_indices = @transform_5, window_bounds = array<i64: 384, 128>}, {pipeline_mode = #tpu.pipeline_mode<synchronous>, transform_indices = @transform_6, window_bounds = array<i64: 128, 128>}, {pipeline_mode = #tpu.pipeline_mode<synchronous>, transform_indices = @transform_7, window_bounds = array<i64: 1, 128>}, {pipeline_mode = #tpu.pipeline_mode<synchronous>, transform_indices = @transform_8, window_bounds = array<i64: 128, 384>}, {pipeline_mode = #tpu.pipeline_mode<synchronous>, transform_indices = @transform_9, window_bounds = array<i64: 1, 384>}, {transform_indices = @transform_10, window_bounds = array<i64: 8, 384>}, {transform_indices = @transform_11, window_bounds = array<i64: 64, 384>}]} {
    %c0 = arith.constant 0 : index
    %c0_0 = arith.constant 0 : index
    %0 = vector.load %arg1[%c0, %c0_0] : memref<8x128xbf16, #tpu.memory_space<vmem>>, vector<8x128xbf16>
    %c0_1 = arith.constant 0 : index
    %c0_2 = arith.constant 0 : index
    %1 = vector.load %arg2[%c0_1, %c0_2] : memref<128x128xbf16, #tpu.memory_space<vmem>>, vector<128x128xbf16>
    %cst = arith.constant dense<0.000000e+00> : vector<8x128xf32>
    %2 = tpu.matmul %0, %1, %cst {dimension_numbers = #tpu.dot_dimension_numbers<[1], [0], [0], [1], [0, 0, 1, 1], [], []>} : vector<8x128xbf16>, vector<128x128xbf16>, vector<8x128xf32> -> vector<8x128xf32>
    %c0_3 = arith.constant 0 : index
    %c0_4 = arith.constant 0 : index
    %3 = vector.load %arg3[%c0_3, %c0_4] : memref<1x128xf32, #tpu.memory_space<vmem>>, vector<1x128xf32>
    %4 = vector.broadcast %3 : vector<1x128xf32> to vector<8x128xf32>
    %5 = arith.addf %2, %4 : vector<8x128xf32>
    %cst_5 = arith.constant 0.000000e+00 : f32
    %6 = vector.broadcast %cst_5 : f32 to vector<8x128xf32>
    %7 = arith.maximumf %5, %6 : vector<8x128xf32>
    %8 = arith.truncf %7 : vector<8x128xf32> to vector<8x128xbf16>
    %c0_6 = arith.constant 0 : index
    %c0_7 = arith.constant 0 : index
    %9 = vector.load %arg4[%c0_6, %c0_7] : memref<128x384xbf16, #tpu.memory_space<vmem>>, vector<128x384xbf16>
    %cst_8 = arith.constant dense<0.000000e+00> : vector<8x384xf32>
    %10 = tpu.matmul %8, %9, %cst_8 {dimension_numbers = #tpu.dot_dimension_numbers<[1], [0], [0], [1], [0, 0, 1, 1], [], []>} : vector<8x128xbf16>, vector<128x384xbf16>, vector<8x384xf32> -> vector<8x384xf32>
    %c0_9 = arith.constant 0 : index
    %c0_10 = arith.constant 0 : index
    %11 = vector.load %arg5[%c0_9, %c0_10] : memref<1x384xf32, #tpu.memory_space<vmem>>, vector<1x384xf32>
    %12 = vector.broadcast %11 : vector<1x384xf32> to vector<8x384xf32>
    %13 = arith.addf %10, %12 : vector<8x384xf32>
    %14 = math.tanh %13 : vector<8x384xf32>
    %c0_11 = arith.constant 0 : index
    %c0_12 = arith.constant 0 : index
    %15 = vector.load %arg11[%c0_11, %c0_12] : memref<8x384xf32, #tpu.memory_space<vmem>>, vector<8x384xf32>
    tpu.vector_store %arg11[%c0_11, %c0_12], %14 {strides = array<i32>} : memref<8x384xf32, #tpu.memory_space<vmem>>, vector<8x384xf32>,
    %16 = arith.truncf %14 : vector<8x384xf32> to vector<8x384xbf16>
    %c0_13 = arith.constant 0 : index
    %c0_14 = arith.constant 0 : index
    %17 = vector.load %arg6[%c0_13, %c0_14] : memref<384x128xbf16, #tpu.memory_space<vmem>>, vector<384x128xbf16>
    %cst_15 = arith.constant dense<0.000000e+00> : vector<8x128xf32>
    %18 = tpu.matmul %16, %17, %cst_15 {dimension_numbers = #tpu.dot_dimension_numbers<[1], [0], [0], [1], [0, 0, 1, 1], [], []>} : vector<8x384xbf16>, vector<384x128xbf16>, vector<8x128xf32> -> vector<8x128xf32>
    %c0_16 = arith.constant 0 : index
    %c0_17 = arith.constant 0 : index
    %19 = vector.load %arg7[%c0_16, %c0_17] : memref<128x128xbf16, #tpu.memory_space<vmem>>, vector<128x128xbf16>
    %cst_18 = arith.constant dense<0.000000e+00> : vector<8x128xf32>
    %20 = tpu.matmul %0, %19, %cst_18 {dimension_numbers = #tpu.dot_dimension_numbers<[1], [0], [0], [1], [0, 0, 1, 1], [], []>} : vector<8x128xbf16>, vector<128x128xbf16>, vector<8x128xf32> -> vector<8x128xf32>
    %21 = arith.addf %18, %20 : vector<8x128xf32>
    %c0_19 = arith.constant 0 : index
    %c0_20 = arith.constant 0 : index
    %22 = vector.load %arg8[%c0_19, %c0_20] : memref<1x128xf32, #tpu.memory_space<vmem>>, vector<1x128xf32>
    %23 = vector.broadcast %22 : vector<1x128xf32> to vector<8x128xf32>
    %24 = arith.addf %21, %23 : vector<8x128xf32>
    %cst_21 = arith.constant 0.000000e+00 : f32
    %25 = vector.broadcast %cst_21 : f32 to vector<8x128xf32>
    %26 = arith.maximumf %24, %25 : vector<8x128xf32>
    %27 = vector.shape_cast %26 : vector<8x128xf32> to vector<8x1x128xf32>
    %28 = vector.shape_cast %27 : vector<8x1x128xf32> to vector<8x1x128xf32>
    %29 = vector.broadcast %28 : vector<8x1x128xf32> to vector<8x8x128xf32>
    %30 = vector.shape_cast %29 : vector<8x8x128xf32> to vector<64x128xf32>
    %31 = arith.truncf %30 : vector<64x128xf32> to vector<64x128xbf16>
    %c0_22 = arith.constant 0 : index
    %c0_23 = arith.constant 0 : index
    %32 = vector.load %arg9[%c0_22, %c0_23] : memref<128x384xbf16, #tpu.memory_space<vmem>>, vector<128x384xbf16>
    %cst_24 = arith.constant dense<0.000000e+00> : vector<64x384xf32>
    %33 = tpu.matmul %31, %32, %cst_24 {dimension_numbers = #tpu.dot_dimension_numbers<[1], [0], [0], [1], [0, 0, 1, 1], [], []>} : vector<64x128xbf16>, vector<128x384xbf16>, vector<64x384xf32> -> vector<64x384xf32>
    %c0_25 = arith.constant 0 : index
    %c0_26 = arith.constant 0 : index
    %34 = vector.load %arg10[%c0_25, %c0_26] : memref<1x384xf32, #tpu.memory_space<vmem>>, vector<1x384xf32>
    %35 = vector.broadcast %34 : vector<1x384xf32> to vector<64x384xf32>
    %36 = arith.addf %33, %35 : vector<64x384xf32>
    %37 = math.tanh %36 : vector<64x384xf32>
    %c0_27 = arith.constant 0 : index
    %c0_28 = arith.constant 0 : index
    %38 = vector.load %arg12[%c0_27, %c0_28] : memref<64x384xf32, #tpu.memory_space<vmem>>, vector<64x384xf32>
    tpu.vector_store %arg12[%c0_27, %c0_28], %37 {strides = array<i32>} : memref<64x384xf32, #tpu.memory_space<vmem>>, vector<64x384xf32>,
    return
  }
  func.func @transform_0(%arg0: i32) -> (i32, i32) {
    %c0_i32 = arith.constant 0 : i32
    %c0_i32_0 = arith.constant 0 : i32
    return %arg0, %c0_i32 : i32, i32
  }
  func.func @transform_1(%arg0: i32) -> (i32, i32) {
    %c0_i32 = arith.constant 0 : i32
    %c0_i32_0 = arith.constant 0 : i32
    %c0_i32_1 = arith.constant 0 : i32
    return %c0_i32, %c0_i32_0 : i32, i32
  }
  func.func @transform_2(%arg0: i32) -> (i32, i32) {
    %c0_i32 = arith.constant 0 : i32
    %c0_i32_0 = arith.constant 0 : i32
    %c0_i32_1 = arith.constant 0 : i32
    return %c0_i32, %c0_i32_0 : i32, i32
  }
  func.func @transform_3(%arg0: i32) -> (i32, i32) {
    %c0_i32 = arith.constant 0 : i32
    %c0_i32_0 = arith.constant 0 : i32
    %c0_i32_1 = arith.constant 0 : i32
    return %c0_i32, %c0_i32_0 : i32, i32
  }
  func.func @transform_4(%arg0: i32) -> (i32, i32) {
    %c0_i32 = arith.constant 0 : i32
    %c0_i32_0 = arith.constant 0 : i32
    %c0_i32_1 = arith.constant 0 : i32
    return %c0_i32, %c0_i32_0 : i32, i32
  }
  func.func @transform_5(%arg0: i32) -> (i32, i32) {
    %c0_i32 = arith.constant 0 : i32
    %c0_i32_0 = arith.constant 0 : i32
    %c0_i32_1 = arith.constant 0 : i32
    return %c0_i32, %c0_i32_0 : i32, i32
  }
  func.func @transform_6(%arg0: i32) -> (i32, i32) {
    %c0_i32 = arith.constant 0 : i32
    %c0_i32_0 = arith.constant 0 : i32
    %c0_i32_1 = arith.constant 0 : i32
    return %c0_i32, %c0_i32_0 : i32, i32
  }
  func.func @transform_7(%arg0: i32) -> (i32, i32) {
    %c0_i32 = arith.constant 0 : i32
    %c0_i32_0 = arith.constant 0 : i32
    %c0_i32_1 = arith.constant 0 : i32
    return %c0_i32, %c0_i32_0 : i32, i32
  }
  func.func @transform_8(%arg0: i32) -> (i32, i32) {
    %c0_i32 = arith.constant 0 : i32
    %c0_i32_0 = arith.constant 0 : i32
    %c0_i32_1 = arith.constant 0 : i32
    return %c0_i32, %c0_i32_0 : i32, i32
  }
  func.func @transform_9(%arg0: i32) -> (i32, i32) {
    %c0_i32 = arith.constant 0 : i32
    %c0_i32_0 = arith.constant 0 : i32
    %c0_i32_1 = arith.constant 0 : i32
    return %c0_i32, %c0_i32_0 : i32, i32
  }
  func.func @transform_10(%arg0: i32) -> (i32, i32) {
    %c0_i32 = arith.constant 0 : i32
    %c0_i32_0 = arith.constant 0 : i32
    return %arg0, %c0_i32 : i32, i32
  }
  func.func @transform_11(%arg0: i32) -> (i32, i32) {
    %c0_i32 = arith.constant 0 : i32
    %c0_i32_0 = arith.constant 0 : i32
    return %arg0, %c0_i32 : i32, i32
  }
}

</mosaic_0001>

<bundles_post_ra>
// kernel: generator_forward.1
= control target key start
LH: loop header
LB: loop body
LE: loop exit
PB: predicated region body
PF: predicated region fallthrough
CT: control target
= control target key end

     0   :  { %17 = vsyncpa [#allocation3], 0  ;;  %s3101_s0 = inlined_call_operand.vmem [shape: bf16[16,128], index: 0, kind: input, shape index: {}]   ;;  %s3102_s1 = inlined_call_operand.hbm [shape: bf16[128,128], index: 1, kind: input, shape index: {}]   ;;  %s3103_s2 = inlined_call_operand.hbm [shape: f32[1,128], index: 2, kind: input, shape index: {}]   ;;  %s3104_s3 = inlined_call_operand.hbm [shape: bf16[128,384], index: 3, kind: input, shape index: {}]   ;;  %s3105_s4 = inlined_call_operand.hbm [shape: f32[1,384], index: 4, kind: input, shape index: {}]   ;;  %s3106_s5 = inlined_call_operand.hbm [shape: bf16[384,128], index: 5, kind: input, shape index: {}]   ;;  %s3107_s6 = inlined_call_operand.hbm [shape: bf16[128,128], index: 6, kind: input, shape index: {}]   ;;  %s3108_s7 = inlined_call_operand.hbm [shape: f32[1,128], index: 7, kind: input, shape index: {}]   ;;  %s3109_s8 = inlined_call_operand.hbm [shape: bf16[128,384], index: 8, kind: input, shape index: {}]   ;;  %s3110_s9 = inlined_call_operand.hbm [shape: f32[1,384], index: 9, kind: input, shape index: {}]   ;;  %s3111_s10 = inlined_call_operand.vmem [shape: f32[16,384], index: 10, kind: output, shape index: {0}]   ;;  %s3112_s11 = inlined_call_operand.vmem [shape: f32[128,384], index: 11, kind: output, shape index: {1}]  }
   0x1   :  { %18 = vsyncpa [#allocation5], 0 }
   0x2   :  { %19 = vsyncpa [#allocation8], 0 }
   0x3   :  { %20 = vsyncpa [#allocation11], 0 }
   0x4   :  { %21 = vsyncpa [#allocation14], 0  ;;  %s2825_s17 = smov 0  }
   0x5 LB: > { %s2748_s18 = smov [#allocation4]   ;;  %s2831_s20 = sadd.s32 4294967295, %s2746_s17   ;;  %s2746_s17 = sphi %s2825_s17, %s27_s17  }
   0x6   : > { %s325_s19 = sshll.u32 %s2748_s18, 4  ;;  %p1928_p0 = scmp.ge.s32.totalorder %s2746_s17, 1  ;;  %s326_s19 = int_to_ptr.vmem [resolvable:$true] %s325_s19 }
   0x7   : > { %p299_p1 = scmp.lt.s32.totalorder %s2746_s17, 3  ;;  %p3113_p2 = scmp.eq.s32.totalorder %s2831_s20, 0 }
   0x8   : > { %s2749_s22 = smov [#allocation7]   ;;  %s2750_s25 = smov [#allocation10]  }
   0x9   : > { %p2836_p3 = pnand %p1928_p0, %p299_p1  ;;  %s349_s23 = sshll.u32 %s2749_s22, 4  ;;  %s350_s23 = int_to_ptr.vmem [resolvable:$true] %s349_s23 }
   0xa   : > { %s372_s26 = sshll.u32 %s2750_s25, 4  ;;  %s2497_s28 = scalar_lea.vmem %s326_s19, 16  ;;  %s2848_s26 = int_to_ptr.vmem [resolvable:$true] %s372_s26 }
   0xb   : > { %s3115_s21 = scalar_select %p2836_p3, 1, 0 }
   0xc   : > { %p2257_p4 = pneg %p2836_p3  ;;  %p2498_p7 = scmp.ne.s32.totalorder %s326_s19, %s2497_s28 }
   0xd   : > { %s2504_s29 = scalar_lea.vmem %s326_s19, 32  ;;  %p2505_p10 = scmp.lt.s32.totalorder %s326_s19, %s326_s19 }
   0xe   : > { %p2844_p5 = pnand %p3113_p2, %p2257_p4  ;;  %p2506_p11 = scmp.lt.s32.totalorder %s2504_s29, %s2497_s28 }
  0x10   : > { %p2852_p6 = pneg %p2844_p5  ;;  %p2507_p12 = por %p2506_p11, %p2505_p10 }
  0x12   : > { %p2500_p8 = pnand %p2498_p7, %p2852_p6 }
  0x14   : > { %p2501_p9 = pneg %p2500_p8 }
  0x16   : > { %p2508_p13 = pnand %p2507_p12, %p2501_p9 }
  0x18   : > { %2511 = shalt.err (!%p2508_p13)
}
  0x19   : > { %2263 = dma.hbm_to_vmem [thread:$0]  (!%p2844_p5), %s3103_s2, 16, %s326_s19, [#allocation5]  }
  0x1a   : > { %s2523_s13 = scalar_lea.vmem %s350_s23, 48  ;;  %s2530_s14 = scalar_lea.vmem %s350_s23, 64 }
  0x1b   : > { %p2524_p0 = scmp.ne.s32.totalorder %s350_s23, %s2523_s13  ;;  %p2531_p7 = scmp.lt.s32.totalorder %s350_s23, %s350_s23 }
  0x1c   : > { %p2532_p8 = scmp.lt.s32.totalorder %s2530_s14, %s2523_s13 }
  0x1d   : > { %p2526_p1 = pnand %p2524_p0, %p2852_p6 }
  0x1e   : > { %p2533_p2 = por %p2532_p8, %p2531_p7 }
  0x1f   : > { %p2527_p4 = pneg %p2526_p1 }
  0x21   : > { %p2534_p3 = pnand %p2533_p2, %p2527_p4 }
  0x23   : > { %2537 = shalt.err (!%p2534_p3)
}
  0x24   : > { %2269 = dma.hbm_to_vmem [thread:$0]  (!%p2844_p5), %s3105_s4, 48, %s350_s23, [#allocation8]  }
  0x25   : > { %s2549_s18 = scalar_lea.vmem %s2848_s26, 1024  ;;  %p2557_p12 = scmp.lt.s32.totalorder %s2848_s26, %s2848_s26 }
  0x26   : > { %p2550_p9 = scmp.ne.s32.totalorder %s2848_s26, %s2549_s18  ;;  %p2558_p13 = scmp.lt.s32.totalorder %s2549_s18, %s2549_s18 }
  0x28   : > { %p2552_p10 = pnand %p2550_p9, %p2852_p6  ;;  %p2559_p2 = por %p2558_p13, %p2557_p12 }
  0x2a   : > { %p2553_p11 = pneg %p2552_p10 }
  0x2c   : > { %p2560_p3 = pnand %p2559_p2, %p2553_p11 }
  0x2e   : > { %2563 = shalt.err (!%p2560_p3)
}
  0x2f   : > { %s2751_s19 = smov 64   ;;  %s2752_s22 = smov 4  }
  0x30   : > { %2275 = dma.hbm_to_vmem [thread:$0]  (!%p2844_p5), %s3107_s6, 1024, %s2848_s26, [#allocation11], %s2751_s19, %s2751_s19, %s2752_s22  }
  0x31   : > { %s2753_s28 = smov [#allocation13]   ;;  %s2754_s30 = smov [#allocation2]  }
  0x32   : > { %s396_s29 = sshll.u32 %s2753_s28, 4  ;;  %s311_s12 = sshll.u32 %s2754_s30, 4  ;;  %s397_s29 = int_to_ptr.vmem [resolvable:$true] %s396_s29  ;;  %s312_s12 = int_to_ptr.vmem [resolvable:$true] %s311_s12 }
  0x33   : > { %s2575_s13 = scalar_lea.vmem %s397_s29, 3072  ;;  %p2583_p7 = scmp.lt.s32.totalorder %s397_s29, %s397_s29 }
  0x34   : > { %p2576_p0 = scmp.ne.s32.totalorder %s397_s29, %s2575_s13  ;;  %p2584_p8 = scmp.lt.s32.totalorder %s2575_s13, %s2575_s13 }
  0x36   : > { %p2578_p1 = pnand %p2576_p0, %p2852_p6  ;;  %p2585_p9 = por %p2584_p8, %p2583_p7 }
  0x38   : > { %p2579_p4 = pneg %p2578_p1 }
  0x3a   : > { %p2586_p10 = pnand %p2585_p9, %p2579_p4 }
  0x3c   : > { %2589 = shalt.err (!%p2586_p10)
}
  0x3d   : > { %s2755_s14 = smov 192   ;;  %s2756_s26 = smov 12  }
  0x3e   : > { %2281 = dma.hbm_to_vmem [thread:$0]  (!%p2844_p5), %s3109_s8, 3072, %s397_s29, [#allocation14], %s2755_s14, %s2755_s14, %s2756_s26  }
  0x3f   : > { %s2601_s18 = scalar_lea.vmem %s312_s12, 1024  ;;  %p2609_p2 = scmp.lt.s32.totalorder %s312_s12, %s312_s12 }
  0x40   : > { %p2602_p11 = scmp.ne.s32.totalorder %s312_s12, %s2601_s18  ;;  %p2610_p3 = scmp.lt.s32.totalorder %s2601_s18, %s2601_s18 }
  0x42   : > { %p2604_p12 = pnand %p2602_p11, %p2852_p6  ;;  %p2611_p0 = por %p2610_p3, %p2609_p2 }
  0x44   : > { %p2605_p13 = pneg %p2604_p12 }
  0x46   : > { %p2612_p1 = pnand %p2611_p0, %p2605_p13 }
  0x48   : > { %2615 = shalt.err (!%p2612_p1)
}
  0x49   : > { %2260 = dma.hbm_to_vmem [thread:$0]  (!%p2844_p5), %s3102_s1, 1024, %s312_s12, [#allocation3], %s2751_s19, %s2751_s19, %s2752_s22  }
  0x4a   : > { %s2757_s28 = smov [#allocation6]   ;;  %s2758_s30 = smov [#allocation9]  }
  0x4b   : > { %s335_s29 = sshll.u32 %s2757_s28, 4  ;;  %s359_s13 = sshll.u32 %s2758_s30, 4  ;;  %s336_s29 = int_to_ptr.vmem [resolvable:$true] %s335_s29  ;;  %s360_s13 = int_to_ptr.vmem [resolvable:$true] %s359_s13 }
  0x4c   : > { %s2627_s15 = scalar_lea.vmem %s336_s29, 3072  ;;  %p2635_p9 = scmp.lt.s32.totalorder %s336_s29, %s336_s29 }
  0x4d   : > { %p2628_p4 = scmp.ne.s32.totalorder %s336_s29, %s2627_s15  ;;  %p2636_p10 = scmp.lt.s32.totalorder %s2627_s15, %s2627_s15 }
  0x4f   : > { %p2630_p7 = pnand %p2628_p4, %p2852_p6  ;;  %p2637_p11 = por %p2636_p10, %p2635_p9 }
  0x51   : > { %p2631_p8 = pneg %p2630_p7 }
  0x53   : > { %p2638_p12 = pnand %p2637_p11, %p2631_p8 }
  0x55   : > { %2641 = shalt.err (!%p2638_p12)
}
  0x56   : > { %2266 = dma.hbm_to_vmem [thread:$0]  (!%p2844_p5), %s3104_s3, 3072, %s336_s29, [#allocation5], %s2755_s14, %s2755_s14, %s2756_s26  }
  0x57   : > { %s2653_s18 = scalar_lea.vmem %s360_s13, 3072  ;;  %p2661_p0 = scmp.lt.s32.totalorder %s360_s13, %s360_s13 }
  0x58   : > { %p2654_p13 = scmp.ne.s32.totalorder %s360_s13, %s2653_s18  ;;  %p2662_p1 = scmp.lt.s32.totalorder %s2653_s18, %s2653_s18 }
  0x5a   : > { %p2656_p2 = pnand %p2654_p13, %p2852_p6  ;;  %p2663_p4 = por %p2662_p1, %p2661_p0 }
  0x5c   : > { %p2657_p3 = pneg %p2656_p2 }
  0x5e   : > { %p2664_p7 = pnand %p2663_p4, %p2657_p3 }
  0x60   : > { %2667 = shalt.err (!%p2664_p7)
}
  0x61   : > { %2272 = dma.hbm_to_vmem [thread:$0]  (!%p2844_p5), %s3106_s5, 3072, %s360_s13, [#allocation8], %s2751_s19, %s2751_s19, %s2752_s22  }
  0x62   : > { %s2759_s14 = smov [#allocation12]   ;;  %s2760_s28 = smov [#allocation15]  }
  0x63   : > { %s386_s26 = sshll.u32 %s2759_s14, 4  ;;  %s410_s29 = sshll.u32 %s2760_s28, 4  ;;  %s387_s26 = int_to_ptr.vmem [resolvable:$true] %s386_s26  ;;  %s411_s29 = int_to_ptr.vmem [resolvable:$true] %s410_s29 }
  0x64   : > { %s2679_s30 = scalar_lea.vmem %s387_s26, 16  ;;  %s2686_s15 = scalar_lea.vmem %s387_s26, 32 }
  0x65   : > { %p2680_p8 = scmp.ne.s32.totalorder %s387_s26, %s2679_s30  ;;  %p2687_p11 = scmp.lt.s32.totalorder %s387_s26, %s387_s26 }
  0x66   : > { %p2688_p12 = scmp.lt.s32.totalorder %s2686_s15, %s2679_s30 }
  0x67   : > { %p2682_p9 = pnand %p2680_p8, %p2852_p6 }
  0x68   : > { %p2689_p13 = por %p2688_p12, %p2687_p11 }
  0x69   : > { %p2683_p10 = pneg %p2682_p9 }
  0x6b   : > { %p2690_p2 = pnand %p2689_p13, %p2683_p10 }
  0x6d   : > { %2693 = shalt.err (!%p2690_p2)
}
  0x6e   : > { %2278 = dma.hbm_to_vmem [thread:$0]  (!%p2844_p5), %s3108_s7, 16, %s387_s26, [#allocation11]  }
  0x6f   : > { %s2705_s13 = scalar_lea.vmem %s411_s29, 48  ;;  %s2712_s12 = scalar_lea.vmem %s411_s29, 64 }
  0x70   : > { %p2706_p3 = scmp.ne.s32.totalorder %s411_s29, %s2705_s13  ;;  %p2713_p4 = scmp.lt.s32.totalorder %s411_s29, %s411_s29 }
  0x71   : > { %p2714_p7 = scmp.lt.s32.totalorder %s2712_s12, %s2705_s13 }
  0x72   : > { %p2708_p0 = pnand %p2706_p3, %p2852_p6 }
  0x73   : > { %p2715_p8 = por %p2714_p7, %p2713_p4 }
  0x74   : > { %p2709_p1 = pneg %p2708_p0 }
  0x76   : > { %p2716_p9 = pnand %p2715_p8, %p2709_p1 }
  0x78   : > { %2719 = shalt.err (!%p2716_p9)
}
  0x79   : > { %2284 = dma.hbm_to_vmem [thread:$0]  (!%p2844_p5), %s3110_s9, 48, %s411_s29, [#allocation14]  }
  0x7a   : > { %p3118_p10 = scmp.ne.s32.totalorder %s3115_s21, 0 }
  0x7b   : > { %p3119_p11 = scmp.eq.s32.totalorder (!%p3118_p10), %s2831_s20, 0 }
  0x7c   : > { %430 = sbr.rel (%p3118_p10) target bundleno = 1045 (0x415), region = 60 }
  0x81   : > { %2725 = dma.done.wait (%p3119_p11), [#allocation3], 1024   ;;  %p3120_p6 = pmov %p3119_p11 }
  0x83   : > { %2727 = vsyncadd (%p3120_p6), [#allocation3], 4294966272  ;;  %p3121_p12 = pmov %p3120_p6 }
  0x84   : > { %p3122_p13 = pmov %p3120_p6 }
  0x85   : > { %2729 = dma.done.wait (%p3121_p12), [#allocation5], 3088  }
  0x86   : > { %2731 = vsyncadd (%p3122_p13), [#allocation5], 4294964208  ;;  %p3123_p2 = pmov %p3120_p6 }
  0x88   : > { %2733 = dma.done.wait (%p3123_p2), [#allocation8], 3120   ;;  %p3124_p5 = pmov %p3123_p2 }
  0x89   : > { %p3125_p3 = pmov %p3123_p2 }
  0x8a   : > { %2735 = vsyncadd (%p3124_p5), [#allocation8], 4294964176 }
  0x8b   : > { %2737 = dma.done.wait (%p3125_p3), [#allocation11], 1040   ;;  %p3126_p0 = pmov %p3123_p2 }
  0x8d   : > { %2739 = vsyncadd (%p3126_p0), [#allocation11], 4294966256  ;;  %p3127_p1 = pmov %p3126_p0 }
  0x8e   : > { %p3128_p4 = pmov %p3126_p0 }
  0x8f   : > { %2741 = dma.done.wait (%p3127_p1), [#allocation14], 3120  }
  0x90   : > { %2743 = vsyncadd (%p3128_p4), [#allocation14], 4294964176  ;;  %v2761_v0 = vmov 0.0   ;;  %vm2762_vm0 = vmmov 0   ;;  %v2328_v1 = vld [vmem:[#allocation2 + $0x38] sm:$0xff]   ;;  %v2329_v2 = vld [vmem:[#allocation2 + $0x30] sm:$0xff]  }
  0x91   : > { %2115 = vmatprep.subr.bf16.mxu0 %v2761_v0  ;;  %2131 = vmatprep.mubr.msk.bf16.mxu0 %vm2762_vm0, %v2761_v0  ;;  %v2330_v3 = vld [vmem:[#allocation2 + $0x28] sm:$0xff]   ;;  %v2331_v6 = vld [vmem:[#allocation2 + $0x20] sm:$0xff]   ;;  %v2332_v10 = vld [vmem:[#allocation2 + $0x18] sm:$0xff]   ;;  %p507_p7 = scmp.lt.s32.totalorder %s2831_s20, 1  ;;  %v2763_v34 = vmov 0   ;;  %s1951_s30 = sshll.u32 %s2831_s20, 3 }
  0x92   : > { %2116 = vmatpush3.bf16.msra.mxu0 %v2328_v1  ;;  %v2336_v4 = vld [vmem:[#allocation6 + $0xac] ss:$12 sps:$4 sm:$0xff]   ;;  %v2338_v5 = vld [vmem:[#allocation6 + $0xa8] ss:$12 sps:$4 sm:$0xff]   ;;  %v2342_v8 = vld [vmem:[#allocation6 + $0x90] ss:$12 sps:$4 sm:$0xff]   ;;  %847 = vmatprep.mubr.bf16.mxu1 %v2763_v34 }
  0x93   : > { %2117 = vmatprep.subr.bf16.mxu0 %v2761_v0  ;;  %815 = vmatprep.subr.bf16.mxu1 %v2336_v4  ;;  %v2340_v7 = vld [vmem:[#allocation6 + $0x94] ss:$12 sps:$4 sm:$0xff]   ;;  %v2344_v9 = vld [vmem:[#allocation6 + $0x7c] ss:$12 sps:$4 sm:$0xff]   ;;  %v2346_v11 = vld [vmem:[#allocation6 + $0x78] ss:$12 sps:$4 sm:$0xff]  }
  0x94   : > { %816 = vmatpush1.bf16.msra.mxu1 %v2338_v5  ;;  %v2348_v12 = vld [vmem:[#allocation6 + $0x64] ss:$12 sps:$4 sm:$0xff]   ;;  %s2970_s21 = scalar_select %p507_p7, %s2831_s20, 1  ;;  %v2350_v14 = vld [vmem:[#allocation6 + $0x60] ss:$12 sps:$4 sm:$0xff]   ;;  %v2380_v46 = vld [vmem:[#allocation9 + $0x70] sm:$0xff]  }
  0x95   : > { %817 = vmatprep.subr.bf16.mxu1 %v2340_v7  ;;  %v2333_v13 = vld [vmem:[#allocation2 + $0x10] sm:$0xff]   ;;  %v2334_v16 = vld [vmem:[#allocation2 + $0x8] sm:$0xff]   ;;  %v2335_v19 = vld [vmem:[#allocation2] sm:$0xff]   ;;  %p517_p8 = scmp.lt.s32.totalorder %s1951_s30, 15 }
  0x96   : > { %2118 = vmatpush3.bf16.msra.mxu0 %v2329_v2  ;;  %v2352_v15 = vld [vmem:[#allocation6 + $0x4c] ss:$12 sps:$4 sm:$0xff]   ;;  %s1949_s24 = sshll.u32 %s2970_s21, 2  ;;  %v2354_v17 = vld [vmem:[#allocation6 + $0x48] ss:$12 sps:$4 sm:$0xff]   ;;  %v2377_v35 = vld [vmem:[#allocation9 + $0x78] sm:$0xff]  }
  0x97   : > { %2119 = vmatprep.subr.bf16.mxu0 %v2761_v0  ;;  %v2356_v18 = vld [vmem:[#allocation6 + $0x34] ss:$12 sps:$4 sm:$0xff]   ;;  %s510_s25 = scalar_lea.vmem %s3101_s0, %s1949_s24  ;;  %v2358_v20 = vld [vmem:[#allocation6 + $0x30] ss:$12 sps:$4 sm:$0xff]   ;;  %v2343_v24 = vld [vmem:[#allocation6 + $0x98] ss:$12 sps:$4 sm:$0xff]  }
  0x98   : > { %818 = vmatpush1.bf16.msra.mxu1 %v2342_v8  ;;  %v2360_v21 = vld [vmem:[#allocation6 + $0x1c] ss:$12 sps:$4 sm:$0xff]   ;;  %v2347_v25 = vld [vmem:[#allocation6 + $0x80] ss:$12 sps:$4 sm:$0xff]   ;;  %v2359_v28 = vld [vmem:[#allocation6 + $0x38] ss:$12 sps:$4 sm:$0xff]  }
  0x99   : > { %819 = vmatprep.subr.bf16.mxu1 %v2344_v9  ;;  %v2979_v22 = vld [vmem:[%s510_s25] sm:$0xf]  ;;  %v2351_v26 = vld [vmem:[#allocation6 + $0x68] ss:$12 sps:$4 sm:$0xff]   ;;  %v2362_v29 = vld [vmem:[#allocation6 + $0x18] ss:$12 sps:$4 sm:$0xff]  }
  0x9a   : > { %2120 = vmatpush3.bf16.msra.mxu0 %v2330_v3  ;;  %v2339_v23 = vld [vmem:[#allocation6 + $0xb0] ss:$12 sps:$4 sm:$0xff]   ;;  %v2363_v30 = vld [vmem:[#allocation6 + $0x20] ss:$12 sps:$4 sm:$0xff]   ;;  %v2367_v33 = vld [vmem:[#allocation6 + $0x8] ss:$12 sps:$4 sm:$0xff]  }
  0x9b   : > { %2121 = vmatprep.subr.bf16.mxu0 %v2761_v0  ;;  %v2355_v27 = vld [vmem:[#allocation6 + $0x50] ss:$12 sps:$4 sm:$0xff]   ;;  %v2366_v32 = vld [vmem:[#allocation6] ss:$12 sps:$4 sm:$0xff]   ;;  %v2369_v47 = vld [vmem:[#allocation10 + $0x30] sm:$0xff]   ;;  %s2219_s14 = smul.u32 24, %s2970_s21 }
  0x9c   : > { %820 = vmatpush1.bf16.msra.mxu1 %v2346_v11  ;;  %v2364_v31 = vld [vmem:[#allocation6 + $0x4] ss:$12 sps:$4 sm:$0xff]   ;;  %v1953_v36 = vld [vmem:[#allocation4] ss:$0 sm:$0xff]  ;;  %v2381_v48 = vld [vmem:[#allocation9 + $0x30] sm:$0xff]   ;;  %s3130_s30 = smov (!%p517_p8, %s1951_s30), 15 }
  0x9d   : > { %821 = vmatprep.subr.bf16.mxu1 %v2348_v12  ;;  %v2368_v42 = vld [vmem:[#allocation10 + $0x38] sm:$0xff]   ;;  %v2383_v49 = vld [vmem:[#allocation9 + $0x68] sm:$0xff]   ;;  %v2371_v52 = vld [vmem:[#allocation10 + $0x20] sm:$0xff]   ;;  %s515_s29 = scalar_lea.vmem %s3111_s10, %s2219_s14  ;;  %s2220_s20 = smul.u32 24, %s3130_s30 }
  0x9e   : > { %2122 = vmatpush3.bf16.msra.mxu0 %v2331_v6  ;;  %v2378_v44 = vld [vmem:[#allocation9 + $0x38] sm:$0xff]   ;;  %v2370_v50 = vld [vmem:[#allocation10 + $0x28] sm:$0xff]   ;;  %v2373_v54 = vld [vmem:[#allocation10 + $0x10] sm:$0xff]  }
  0x9f   : > { %2123 = vmatprep.subr.bf16.mxu0 %v2761_v0  ;;  %v2384_v51 = vld [vmem:[#allocation9 + $0x28] sm:$0xff]   ;;  %v2372_v53 = vld [vmem:[#allocation10 + $0x18] sm:$0xff]   ;;  %v2375_v56 = vld [vmem:[#allocation10] sm:$0xff]   ;;  %s3063_s22 = scalar_lea.vmem %s3112_s11, %s2220_s20 }
  0xa0   : > { %822 = vmatpush1.bf16.msra.mxu1 %v2350_v14  ;;  %v2374_v55 = vld [vmem:[#allocation10 + $0x8] sm:$0xff]   ;;  %v2376_v57 = vld [vmem:[#allocation9 + $0xb8] sm:$0xff]   ;;  %v2379_v58 = vld [vmem:[#allocation9 + $0xb0] sm:$0xff]   ;;  %v672_v14 = vlaneseq }
  0xa1   : > { %823 = vmatprep.subr.bf16.mxu1 %v2352_v15  ;;  %v2382_v59 = vld [vmem:[#allocation9 + $0xa8] sm:$0xff]   ;;  %v2385_v60 = vld [vmem:[#allocation9 + $0xa0] sm:$0xff]   ;;  %v2388_v63 = vld [vmem:[#allocation9 + $0x98] sm:$0xff]  }
  0xa2   : > { %2124 = vmatpush3.bf16.msra.mxu0 %v2332_v10  ;;  %v2386_v61 = vld [vmem:[#allocation9 + $0x60] sm:$0xff]   ;;  %v2389_v1 = vld [vmem:[#allocation9 + $0x58] sm:$0xff]   ;;  %v2391_v3 = vld [vmem:[#allocation9 + $0x90] sm:$0xff]   ;;  %v3014_v15 = vshrl.u32 %v672_v14, 7 }
  0xa3   : > { %2125 = vmatprep.subr.bf16.mxu0 %v2761_v0  ;;  %v2387_v62 = vld [vmem:[#allocation9 + $0x20] sm:$0xff]   ;;  %v2390_v2 = vld [vmem:[#allocation9 + $0x18] sm:$0xff]   ;;  %v2392_v4 = vld [vmem:[#allocation9 + $0x50] sm:$0xff]  }
  0xa4   : > { %824 = vmatpush1.bf16.msra.mxu1 %v2354_v17  ;;  %v2393_v5 = vld [vmem:[#allocation9 + $0x10] sm:$0xff]   ;;  %v2394_v6 = vld [vmem:[#allocation9 + $0x88] sm:$0xff]   ;;  %v2397_v9 = vld [vmem:[#allocation9 + $0x80] sm:$0xff]  }
  0xa5   : > { %825 = vmatprep.subr.bf16.mxu1 %v2356_v18  ;;  %v2395_v7 = vld [vmem:[#allocation9 + $0x48] sm:$0xff]   ;;  %v2398_v10 = vld [vmem:[#allocation9 + $0x40] sm:$0xff]   ;;  %v670_v17 = vld [vmem:[#allocation7] sm:$0x7]  ;;  %v678_v18 = vsub.s32 1, %v3014_v15 }
  0xa6   : > { %2126 = vmatpush3.bf16.msra.mxu0 %v2333_v13  ;;  %v2396_v8 = vld [vmem:[#allocation9 + $0x8] sm:$0xff]   ;;  %v2399_v11 = vld [vmem:[#allocation9] sm:$0xff]  }
  0xa7   : > { %2127 = vmatprep.subr.bf16.mxu0 %v2761_v0  ;;  %v2402_v12 = vld [vmem:[#allocation13 + $0xac] ss:$12 sps:$4 sm:$0xff]   ;;  %v2403_v13 = vld [vmem:[#allocation13 + $0xb0] ss:$12 sps:$4 sm:$0xff]  }
  0xa8   : > { %826 = vmatpush1.bf16.msra.mxu1 %v2358_v20 }
  0xa9   : > { %827 = vmatprep.subr.bf16.mxu1 %v2360_v21  ;;  %v679_v21 = vrot.slane %v670_v17, %v678_v18 }
  0xaa   : > { %2128 = vmatpush3.bf16.msra.mxu0 %v2334_v16  ;;  %v3017_v16 = vsub.s32 0, %v3014_v15 }
  0xab   : > { %2129 = vmatprep.subr.bf16.mxu0 %v2761_v0 }
  0xac   : > { %828 = vmatpush1.bf16.msra.mxu1 %v2362_v29 }
  0xad   : > { %829 = vmatprep.subr.bf16.mxu1 %v2364_v31 }
  0xae   : > { %2130 = vmatpush3.bf16.msra.mxu0 %v2335_v19  ;;  %v675_v19 = vrot.slane %v670_v17, %v3017_v16 }
  0xaf   : > { %2135 = vmatprep.subr.bf16.mxu0 %v2761_v0 }
  0xb0   : > { %830 = vmatpush1.bf16.msra.mxu1 %v2366_v32 }
  0xb1   : > { %2132 = vmatmul.mubr.bf16.vlgmr.msra.gmra.mxu0 %v2979_v22  ;;  %2155 = vmatprep.subr.bf16.mxu1 %v2761_v0 }
  0xb2   : > { %2136 = vmatpush3.bf16.msra.mxu0 %v2339_v23  ;;  %2151 = vmatprep.mubr.msk.bf16.mxu0 %vm2762_vm0, %v2761_v0 }
  0xb3   : > { %2137 = vmatprep.subr.bf16.mxu0 %v2761_v0 }
  0xb6   : > { %2138 = vmatpush3.bf16.msra.mxu0 %v2343_v24 }
  0xb7   : > { %2139 = vmatprep.subr.bf16.mxu0 %v2761_v0 }
  0xba   : > { %2140 = vmatpush3.bf16.msra.mxu0 %v2347_v25 }
  0xbb   : > { %2141 = vmatprep.subr.bf16.mxu0 %v2761_v0 }
  0xbe   : > { %2142 = vmatpush3.bf16.msra.mxu0 %v2351_v26 }
  0xbf   : > { %2143 = vmatprep.subr.bf16.mxu0 %v2761_v0 }
  0xc2   : > { %2144 = vmatpush3.bf16.msra.mxu0 %v2355_v27 }
  0xc3   : > { %2145 = vmatprep.subr.bf16.mxu0 %v2761_v0 }
  0xc6   : > { %2146 = vmatpush3.bf16.msra.mxu0 %v2359_v28 }
  0xc7   : > { %2147 = vmatprep.subr.bf16.mxu0 %v2761_v0 }
  0xca   : > { %2148 = vmatpush3.bf16.msra.mxu0 %v2363_v30 }
  0xcb   : > { %2149 = vmatprep.subr.bf16.mxu0 %v2761_v0 }
  0xce   : > { %2150 = vmatpush3.bf16.msra.mxu0 %v2367_v33 }
  0xcf   : > { %2072 = vmatprep.subr.bf16.mxu0 %v2377_v35 }
 0x171   : > { %v630_v37 = vpop.f32.mrf.mxu0 }
 0x172   : > { %v631_v38 = vadd.f32 %v1953_v36, %v630_v37 }
 0x173   : > { %v2133_v39 = vpop.f32.mrf.mxu0 }
 0x174   : > { %v636_v40 = vmax.f32 %v631_v38, 0.0  ;;  %v2400_v39 = vld [vmem:[#allocation13 + $0xa8] ss:$12 sps:$4 sm:$0xff]  }
 0x175   : > { %v633_v41 = vpop.f32.mrf.mxu0 }
 0x176   : > { %v637_v43 = vpack.c.bf16 %v636_v40, %v636_v40  ;;  %v2406_v41 = vld [vmem:[#allocation13 + $0x94] ss:$12 sps:$4 sm:$0xff]  }
 0x177   : > { %v2134_v45 = vpop.f32.mrf.mxu0 }
 0x178   : > { %848 = vmatmul.mubr.bf16.vlgmr.msra.gmra.mxu1 %v637_v43  ;;  %2152 = vmatmul.mubr.bf16.vlgmr.msra.gmra.mxu0 %v637_v43 }
 0x179   : > { %2156 = vmatpush3.bf16.msra.mxu1 %v2368_v42  ;;  %2171 = vmatprep.mubr.msk.bf16.mxu1 %vm2762_vm0, %v2761_v0  ;;  %v2404_v42 = vld [vmem:[#allocation13 + $0x90] ss:$12 sps:$4 sm:$0xff]  }
 0x17a   : > { %2157 = vmatprep.subr.bf16.mxu1 %v2761_v0  ;;  %2073 = vmatpush3.bf16.msra.mxu0 %v2378_v44 }
 0x17b   : > { %2074 = vmatprep.subr.bf16.mxu0 %v2380_v46 }
 0x17d   : > { %2158 = vmatpush3.bf16.msra.mxu1 %v2369_v47  ;;  %v2407_v47 = vld [vmem:[#allocation13 + $0x98] ss:$12 sps:$4 sm:$0xff]  }
 0x17e   : > { %2159 = vmatprep.subr.bf16.mxu1 %v2761_v0  ;;  %2075 = vmatpush3.bf16.msra.mxu0 %v2381_v48  ;;  %v2410_v48 = vld [vmem:[#allocation13 + $0x7c] ss:$12 sps:$4 sm:$0xff]  }
 0x17f   : > { %2076 = vmatprep.subr.bf16.mxu0 %v2383_v49  ;;  %v2408_v49 = vld [vmem:[#allocation13 + $0x78] ss:$12 sps:$4 sm:$0xff]  }
 0x181   : > { %2160 = vmatpush3.bf16.msra.mxu1 %v2370_v50  ;;  %v2411_v50 = vld [vmem:[#allocation13 + $0x80] ss:$12 sps:$4 sm:$0xff]  }
 0x182   : > { %2161 = vmatprep.subr.bf16.mxu1 %v2761_v0  ;;  %2077 = vmatpush3.bf16.msra.mxu0 %v2384_v51  ;;  %v2414_v51 = vld [vmem:[#allocation13 + $0x64] ss:$12 sps:$4 sm:$0xff]  }
 0x183   : > { %2078 = vmatprep.subr.bf16.mxu0 %v2386_v61  ;;  %v2424_v61 = vld [vmem:[#allocation13 + $0x18] ss:$12 sps:$4 sm:$0xff]  }
 0x185   : > { %2162 = vmatpush3.bf16.msra.mxu1 %v2371_v52  ;;  %v2412_v52 = vld [vmem:[#allocation13 + $0x60] ss:$12 sps:$4 sm:$0xff]  }
 0x186   : > { %2163 = vmatprep.subr.bf16.mxu1 %v2761_v0  ;;  %2079 = vmatpush3.bf16.msra.mxu0 %v2387_v62  ;;  %v2427_v62 = vld [vmem:[#allocation13 + $0x20] ss:$12 sps:$4 sm:$0xff]  }
 0x187   : > { %2080 = vmatprep.subr.bf16.mxu0 %v2389_v1  ;;  %v2431_v1 = vld [vmem:[#allocation13 + $0x8] ss:$12 sps:$4 sm:$0xff]  }
 0x189   : > { %2164 = vmatpush3.bf16.msra.mxu1 %v2372_v53  ;;  %v2415_v53 = vld [vmem:[#allocation13 + $0x68] ss:$12 sps:$4 sm:$0xff]  }
 0x18a   : > { %2165 = vmatprep.subr.bf16.mxu1 %v2761_v0  ;;  %2081 = vmatpush3.bf16.msra.mxu0 %v2390_v2  ;;  %v2428_v2 = vld [vmem:[#allocation13] ss:$12 sps:$4 sm:$0xff]  }
 0x18b   : > { %2082 = vmatprep.subr.bf16.mxu0 %v2392_v4 }
 0x18d   : > { %2166 = vmatpush3.bf16.msra.mxu1 %v2373_v54  ;;  %v2418_v54 = vld [vmem:[#allocation13 + $0x4c] ss:$12 sps:$4 sm:$0xff]  }
 0x18e   : > { %2167 = vmatprep.subr.bf16.mxu1 %v2761_v0  ;;  %2083 = vmatpush3.bf16.msra.mxu0 %v2393_v5 }
 0x18f   : > { %2084 = vmatprep.subr.bf16.mxu0 %v2395_v7 }
 0x191   : > { %2168 = vmatpush3.bf16.msra.mxu1 %v2374_v55  ;;  %v2416_v55 = vld [vmem:[#allocation13 + $0x48] ss:$12 sps:$4 sm:$0xff]  }
 0x192   : > { %2169 = vmatprep.subr.bf16.mxu1 %v2761_v0  ;;  %2085 = vmatpush3.bf16.msra.mxu0 %v2396_v8 }
 0x193   : > { %2086 = vmatprep.subr.bf16.mxu0 %v2398_v10 }
 0x195   : > { %2170 = vmatpush3.bf16.msra.mxu1 %v2375_v56  ;;  %v2419_v56 = vld [vmem:[#allocation13 + $0x50] ss:$12 sps:$4 sm:$0xff]  }
 0x196   : > { %2175 = vmatprep.subr.bf16.mxu1 %v2761_v0  ;;  %2087 = vmatpush3.bf16.msra.mxu0 %v2399_v11 }
 0x197   : > { %1561 = vmatprep.subr.bf16.mxu0 %v2402_v12 }
 0x198   : > { %2172 = vmatmul.mubr.bf16.vlgmr.msra.gmra.mxu1 %v2979_v22 }
 0x199   : > { %2176 = vmatpush3.bf16.msra.mxu1 %v2376_v57  ;;  %2191 = vmatprep.mubr.msk.bf16.mxu1 %vm2762_vm0, %v2761_v0  ;;  %v2422_v57 = vld [vmem:[#allocation13 + $0x34] ss:$12 sps:$4 sm:$0xff]  }
 0x19a   : > { %2177 = vmatprep.subr.bf16.mxu1 %v2761_v0 }
 0x19d   : > { %2178 = vmatpush3.bf16.msra.mxu1 %v2379_v58  ;;  %v2420_v58 = vld [vmem:[#allocation13 + $0x30] ss:$12 sps:$4 sm:$0xff]  }
 0x19e   : > { %2179 = vmatprep.subr.bf16.mxu1 %v2761_v0 }
 0x1a1   : > { %2180 = vmatpush3.bf16.msra.mxu1 %v2382_v59  ;;  %v2423_v59 = vld [vmem:[#allocation13 + $0x38] ss:$12 sps:$4 sm:$0xff]  }
 0x1a2   : > { %2181 = vmatprep.subr.bf16.mxu1 %v2761_v0 }
 0x1a5   : > { %2182 = vmatpush3.bf16.msra.mxu1 %v2385_v60  ;;  %v2426_v60 = vld [vmem:[#allocation13 + $0x1c] ss:$12 sps:$4 sm:$0xff]  }
 0x1a6   : > { %2183 = vmatprep.subr.bf16.mxu1 %v2761_v0 }
 0x1a9   : > { %2184 = vmatpush3.bf16.msra.mxu1 %v2388_v63  ;;  %v2430_v63 = vld [vmem:[#allocation13 + $0x4] ss:$12 sps:$4 sm:$0xff]  }
 0x1aa   : > { %2185 = vmatprep.subr.bf16.mxu1 %v2761_v0 }
 0x1ad   : > { %2186 = vmatpush3.bf16.msra.mxu1 %v2391_v3 }
 0x1ae   : > { %2187 = vmatprep.subr.bf16.mxu1 %v2761_v0 }
 0x1b1   : > { %2188 = vmatpush3.bf16.msra.mxu1 %v2394_v6  ;;  %v2764_v6 = vmov 1966171168  }
 0x1b2   : > { %2189 = vmatprep.subr.bf16.mxu1 %v2761_v0  ;;  %v682_v0 = vsub.s32 2, %v3014_v15  ;;  %v1293_v7 = vunpack.c.l.s4 %v2764_v6 }
 0x1b4   : > { %v683_v20 = vrot.slane %v670_v17, %v682_v0  ;;  %v1294_v14 = vunpack.c.0.s8 %v1293_v7  ;;  %v2018_v17 = vld [vmem:[#allocation12] ss:$0 sm:$0xff] }
 0x1b5   : > { %2190 = vmatpush3.bf16.msra.mxu1 %v2397_v9 }
 0x1b6   : > { %2195 = vmatprep.subr.bf16.mxu1 %v2403_v13 }
 0x238   : > { %v849_v22 = vpop.f32.mrf.mxu1  ;;  %v890_v23 = vpop.f32.mrf.mxu0 }
 0x239   : > { %v850_v24 = vadd.f32 %v849_v22, %v675_v19  ;;  %v891_v25 = vadd.f32 %v890_v23, %v683_v20  ;;  %v1297_v22 = vsub.s32 %v1294_v14, %v3014_v15 }
 0x23a   : > { %v851_v26 = vpop.f32.mrf.mxu1  ;;  %v2153_v27 = vpop.f32.mrf.mxu0 }
 0x23b   : > { %2432 = vtanh.f32 %v850_v24  ;;  %v852_v28 = vadd.f32 %v851_v26, %v679_v21 }
 0x23c   : > { %2434 = vtanh.f32 %v891_v25  ;;  %v853_v29 = vpop.f32.mrf.mxu1  ;;  %v893_v30 = vpop.f32.mrf.mxu0 }
 0x23d   : > { %2436 = vtanh.f32 %v852_v28 }
 0x23e   : > { %v854_v31 = vpop.f32.mrf.mxu1  ;;  %v2154_v32 = vpop.f32.mrf.mxu0 }
 0x248   : > { %v2433_v33 = vpop.eup %2432 }
 0x249   : > { %v2435_v35 = vpop.eup %2434  ;;  %899 = vst [vmem:[%s515_s29] sm:$0xff] %v2433_v33  ;;  %v902_v40 = vpack.c.bf16 %v2433_v33, %v2433_v33 }
 0x24a   : > { %v2437_v36 = vpop.eup %2436  ;;  %901 = vst [vmem:[%s515_s29 + $0x10] sm:$0xff] %v2435_v35  ;;  %v904_v37 = vpack.c.bf16 %v2435_v35, %v2435_v35 }
 0x24b   : > { %900 = vst [vmem:[%s515_s29 + $0x8] sm:$0xff] %v2437_v36  ;;  %v903_v38 = vpack.c.bf16 %v2437_v36, %v2437_v36 }
 0x24c   : > { %2192 = vmatmul.mubr.bf16.vlgmr.msra.gmra.mxu1 %v904_v37 }
 0x24d   : > { %1233 = vmatprep.mubr.bf16.mxu0 %v903_v38  ;;  %2196 = vmatpush3.bf16.msra.mxu1 %v2403_v13 }
 0x24e   : > { %1234 = vmatmul.mubr.bf16.vlgmr.msra.gmra.mxu0 %v902_v40  ;;  %2197 = vmatprep.subr.bf16.mxu1 %v2407_v47 }
 0x24f   : > { %1562 = vmatpush1.bf16.msra.mxu0 %v2400_v39  ;;  %1593 = vmatprep.mubr.bf16.mxu0 %v2763_v34 }
 0x250   : > { %1563 = vmatprep.subr.bf16.mxu0 %v2406_v41 }
 0x251   : > { %2198 = vmatpush3.bf16.msra.mxu1 %v2407_v47 }
 0x252   : > { %2199 = vmatprep.subr.bf16.mxu1 %v2411_v50 }
 0x253   : > { %1564 = vmatpush1.bf16.msra.mxu0 %v2404_v42 }
 0x254   : > { %1565 = vmatprep.subr.bf16.mxu0 %v2410_v48 }
 0x255   : > { %2200 = vmatpush3.bf16.msra.mxu1 %v2411_v50  ;;  %v1416_v50 = vld [vmem:[#allocation15] sm:$0x7] }
 0x256   : > { %2201 = vmatprep.subr.bf16.mxu1 %v2415_v53 }
 0x257   : > { %1566 = vmatpush1.bf16.msra.mxu0 %v2408_v49 }
 0x258   : > { %v1051_v43 = vpop.f32.mrf.mxu1  ;;  %1567 = vmatprep.subr.bf16.mxu0 %v2414_v51  ;;  %v3044_v51 = vrot.slane %v1416_v50, %v3017_v16 }
 0x259   : > { %2202 = vmatpush3.bf16.msra.mxu1 %v2415_v53  ;;  %v3050_v53 = vrot.slane %v1416_v50, %v678_v18 }
 0x25a   : > { %v2173_v44 = vpop.f32.mrf.mxu1  ;;  %2203 = vmatprep.subr.bf16.mxu1 %v2419_v56 }
 0x25b   : > { %1568 = vmatpush1.bf16.msra.mxu0 %v2412_v52  ;;  %v1429_v52 = vrot.slane %v1416_v50, %v682_v0 }
 0x25c   : > { %v1054_v45 = vpop.f32.mrf.mxu1  ;;  %1569 = vmatprep.subr.bf16.mxu0 %v2418_v54 }
 0x25d   : > { %2204 = vmatpush3.bf16.msra.mxu1 %v2419_v56 }
 0x25e   : > { %v2174_v46 = vpop.f32.mrf.mxu1  ;;  %2205 = vmatprep.subr.bf16.mxu1 %v2423_v59 }
 0x25f   : > { %1570 = vmatpush1.bf16.msra.mxu0 %v2416_v55 }
 0x260   : > { %1571 = vmatprep.subr.bf16.mxu0 %v2422_v57 }
 0x261   : > { %2206 = vmatpush3.bf16.msra.mxu1 %v2423_v59 }
 0x262   : > { %2207 = vmatprep.subr.bf16.mxu1 %v2427_v62 }
 0x263   : > { %1572 = vmatpush1.bf16.msra.mxu0 %v2420_v58 }
 0x264   : > { %1573 = vmatprep.subr.bf16.mxu0 %v2426_v60 }
 0x265   : > { %2208 = vmatpush3.bf16.msra.mxu1 %v2427_v62 }
 0x266   : > { %2209 = vmatprep.subr.bf16.mxu1 %v2431_v1 }
 0x267   : > { %1574 = vmatpush1.bf16.msra.mxu0 %v2424_v61 }
 0x268   : > { %1575 = vmatprep.subr.bf16.mxu0 %v2430_v63 }
 0x269   : > { %2210 = vmatpush3.bf16.msra.mxu1 %v2431_v1 }
 0x26b   : > { %1576 = vmatpush1.bf16.msra.mxu0 %v2428_v2 }
 0x30c   : > { %v1275_v3 = vpop.f32.mrf.mxu1 }
 0x30e   : > { %v2193_v4 = vpop.f32.mrf.mxu1  ;;  %v2088_v5 = vpop.f32.mrf.mxu0 }
 0x310   : > { %v1278_v8 = vpop.f32.mrf.mxu1  ;;  %v2089_v9 = vpop.f32.mrf.mxu0 }
 0x311   : > { %v2090_v10 = vadd.f32 %v2089_v9, %v2088_v5 }
 0x312   : > { %v2194_v11 = vpop.f32.mrf.mxu1  ;;  %v2091_v12 = vpop.f32.mrf.mxu0 }
 0x313   : > { %v1236_v13 = vadd.f32 %v2090_v10, %v1051_v43 }
 0x314   : > { %v2092_v19 = vpop.f32.mrf.mxu0 }
 0x315   : > { %v1276_v20 = vadd.f32 %v1275_v3, %v1236_v13 }
 0x317   : > { %v1288_v21 = vadd.f32 %v2018_v17, %v1276_v20 }
 0x319   : > { %v1289_v23 = vmax.f32 %v1288_v21, 0.0 }
 0x31b   : > { %v1291_v24 = vcombine.high %v1289_v23, %v1289_v23  ;;  %v1298_v25 = vrot.slane %v1289_v23, %v1297_v22 }
 0x31d   : > { %v1306_v26 = vcombine.high %v1298_v25, %v1298_v25  ;;  %v1314_v27 = vrot.slane %v1298_v25, %v1297_v22  ;;  %v1305_v28 = vrot.slane %v1291_v24, %v1297_v22 }
 0x31f   : > { %v1328_v29 = vrot.slane %v1306_v26, %v1297_v22  ;;  %v1336_v30 = vcombine.high %v1314_v27, %v1314_v27  ;;  %v1307_v31 = vcombine.high %v1305_v28, %v1305_v28  ;;  %v1321_v32 = vrot.slane %v1305_v28, %v1297_v22 }
 0x320   : > { %v1343_v33 = vrot.slane %v1314_v27, %v3017_v16 }
 0x321   : > { %v1347_v35 = vrot.slane %v1328_v29, %v3017_v16  ;;  %v1338_v36 = vcombine.high %v1328_v29, %v1328_v29  ;;  %v1335_v37 = vrot.slane %v1307_v31, %v1297_v22  ;;  %v1351_v38 = vrot.slane %v1336_v30, %v3017_v16 }
 0x322   : > { %v1359_v41 = vrot.slane %v1321_v32, %v3017_v16  ;;  %v1337_v46 = vcombine.high %v1321_v32, %v1321_v32 }
 0x323   : > { %v1380_v39 = vpack.c.bf16 %v1347_v35, %v1343_v33  ;;  %v1355_v40 = vrot.slane %v1338_v36, %v3017_v16  ;;  %v1363_v42 = vrot.slane %v1335_v37, %v3017_v16  ;;  %v1339_v45 = vcombine.high %v1335_v37, %v1335_v37 }
 0x324   : > { %v1367_v48 = vrot.slane %v1337_v46, %v3017_v16 }
 0x325   : > { %1594 = vmatmul.mubr.bf16.vlgmr.msra.gmra.mxu0 %v1380_v39  ;;  %2211 = vmatprep.mubr.bf16.mxu1 %v1380_v39  ;;  %v1381_v43 = vpack.c.bf16 %v1355_v40, %v1351_v38  ;;  %v1382_v44 = vpack.c.bf16 %v1363_v42, %v1359_v41  ;;  %v1371_v47 = vrot.slane %v1339_v45, %v3017_v16 }
 0x326   : > { %1603 = vmatprep.mubr.bf16.mxu0 %v2763_v34 }
 0x327   : > { %2212 = vmatmul.mubr.bf16.vlgmr.msra.gmra.mxu1 %v1381_v43  ;;  %v1383_v49 = vpack.c.bf16 %v1371_v47, %v1367_v48 }
 0x328   : > { %2215 = vmatprep.mubr.bf16.mxu1 %v1382_v44 }
 0x32d   : > { %1604 = vmatmul.mubr.bf16.gmra.mxu0 %v1381_v43 }
 0x32e   : > { %1613 = vmatprep.mubr.bf16.mxu0 %v2763_v34 }
 0x32f   : > { %2216 = vmatmul.mubr.bf16.gmra.mxu1 %v1383_v49 }
 0x335   : > { %1614 = vmatmul.mubr.bf16.gmra.mxu0 %v1382_v44 }
 0x336   : > { %1623 = vmatprep.mubr.bf16.mxu0 %v2763_v34 }
 0x33d   : > { %1624 = vmatmul.mubr.bf16.gmra.mxu0 %v1383_v49 }
 0x3e5   : > { %v1595_v54 = vpop.f32.mrf.mxu0 }
 0x3e6   : > { %v1596_v55 = vadd.f32 %v1595_v54, %v3044_v51 }
 0x3e7   : > { %v1597_v56 = vpop.f32.mrf.mxu0  ;;  %v2213_v57 = vpop.f32.mrf.mxu1 }
 0x3e8   : > { %2438 = vtanh.f32 %v1596_v55  ;;  %v1598_v34 = vadd.f32 %v1597_v56, %v3050_v53  ;;  %v1677_v58 = vadd.f32 %v2213_v57, %v1429_v52 }
 0x3e9   : > { %v1599_v16 = vpop.f32.mrf.mxu0  ;;  %v1668_v59 = vpop.f32.mrf.mxu1 }
 0x3ea   : > { %2440 = vtanh.f32 %v1598_v34  ;;  %v1600_v0 = vadd.f32 %v1599_v16, %v3044_v51  ;;  %v1669_v60 = vadd.f32 %v1668_v59, %v1429_v52 }
 0x3eb   : > { %2442 = vtanh.f32 %v1677_v58  ;;  %v1601_v15 = vpop.f32.mrf.mxu0  ;;  %v2214_v18 = vpop.f32.mrf.mxu1 }
 0x3ec   : > { %2444 = vtanh.f32 %v1600_v0  ;;  %v1602_v61 = vadd.f32 %v1601_v15, %v3050_v53  ;;  %v1680_v62 = vadd.f32 %v2214_v18, %v1429_v52 }
 0x3ed   : > { %2446 = vtanh.f32 %v1669_v60  ;;  %v1605_v63 = vpop.f32.mrf.mxu0  ;;  %v1671_v1 = vpop.f32.mrf.mxu1 }
 0x3ee   : > { %2448 = vtanh.f32 %v1602_v61  ;;  %v1606_v2 = vadd.f32 %v1605_v63, %v3044_v51  ;;  %v1672_v3 = vadd.f32 %v1671_v1, %v1429_v52 }
 0x3ef   : > { %2450 = vtanh.f32 %v1680_v62  ;;  %v1607_v4 = vpop.f32.mrf.mxu0  ;;  %v2217_v5 = vpop.f32.mrf.mxu1 }
 0x3f0   : > { %2452 = vtanh.f32 %v1606_v2  ;;  %v1608_v6 = vadd.f32 %v1607_v4, %v3050_v53  ;;  %v1693_v7 = vadd.f32 %v2217_v5, %v1429_v52 }
 0x3f1   : > { %2454 = vtanh.f32 %v1672_v3  ;;  %v1609_v8 = vpop.f32.mrf.mxu0  ;;  %v1684_v9 = vpop.f32.mrf.mxu1 }
 0x3f2   : > { %2456 = vtanh.f32 %v1608_v6  ;;  %v1610_v10 = vadd.f32 %v1609_v8, %v3044_v51  ;;  %v1685_v11 = vadd.f32 %v1684_v9, %v1429_v52 }
 0x3f3   : > { %2458 = vtanh.f32 %v1693_v7  ;;  %v1611_v12 = vpop.f32.mrf.mxu0  ;;  %v2218_v13 = vpop.f32.mrf.mxu1 }
 0x3f4   : > { %2460 = vtanh.f32 %v1610_v10  ;;  %v1612_v14 = vadd.f32 %v1611_v12, %v3050_v53  ;;  %v1696_v17 = vadd.f32 %v2218_v13, %v1429_v52 }
 0x3f5   : > { %v2439_v19 = vpop.eup %2438  ;;  %2462 = vtanh.f32 %v1685_v11  ;;  %v1615_v20 = vpop.f32.mrf.mxu0 }
 0x3f6   : > { %v1687_v21 = vpop.f32.mrf.mxu1  ;;  %1723 = vst [vmem:[%s3063_s22] sm:$0xff] %v2439_v19  ;;  %2464 = vtanh.f32 %v1612_v14  ;;  %v1616_v22 = vadd.f32 %v1615_v20, %v3044_v51 }
 0x3f7   : > { %v1688_v23 = vadd.f32 %v1687_v21, %v1429_v52  ;;  %v2441_v24 = vpop.eup %2440  ;;  %2466 = vtanh.f32 %v1696_v17  ;;  %v1617_v25 = vpop.f32.mrf.mxu0 }
 0x3f8   : > { %v2443_v26 = vpop.eup %2442  ;;  %1724 = vst [vmem:[%s3063_s22 + $0x8] sm:$0xff] %v2441_v24  ;;  %2468 = vtanh.f32 %v1616_v22  ;;  %v1618_v27 = vadd.f32 %v1617_v25, %v3050_v53 }
 0x3f9   : > { %v2445_v28 = vpop.eup %2444  ;;  %1731 = vst [vmem:[%s3063_s22 + $0x40] sm:$0xff] %v2443_v26  ;;  %2470 = vtanh.f32 %v1688_v23  ;;  %v1619_v29 = vpop.f32.mrf.mxu0 }
 0x3fa   : > { %v2447_v30 = vpop.eup %2446  ;;  %1726 = vst [vmem:[%s3063_s22 + $0x18] sm:$0xff] %v2445_v28  ;;  %2472 = vtanh.f32 %v1618_v27  ;;  %v1620_v31 = vadd.f32 %v1619_v29, %v3044_v51 }
 0x3fb   : > { %v2449_v32 = vpop.eup %2448  ;;  %1725 = vst [vmem:[%s3063_s22 + $0x10] sm:$0xff] %v2447_v30  ;;  %v1621_v33 = vpop.f32.mrf.mxu0 }
 0x3fc   : > { %v2451_v35 = vpop.eup %2450  ;;  %1727 = vst [vmem:[%s3063_s22 + $0x20] sm:$0xff] %v2449_v32  ;;  %2474 = vtanh.f32 %v1620_v31  ;;  %v1622_v36 = vadd.f32 %v1621_v33, %v3050_v53 }
 0x3fd   : > { %v2453_v37 = vpop.eup %2452  ;;  %1734 = vst [vmem:[%s3063_s22 + $0x58] sm:$0xff] %v2451_v35  ;;  %v1625_v38 = vpop.f32.mrf.mxu0 }
 0x3fe   : > { %v2455_v39 = vpop.eup %2454  ;;  %1729 = vst [vmem:[%s3063_s22 + $0x30] sm:$0xff] %v2453_v37  ;;  %2476 = vtanh.f32 %v1622_v36  ;;  %v1626_v40 = vadd.f32 %v1625_v38, %v3044_v51 }
 0x3ff   : > { %v2457_v41 = vpop.eup %2456  ;;  %1728 = vst [vmem:[%s3063_s22 + $0x28] sm:$0xff] %v2455_v39  ;;  %v1627_v42 = vpop.f32.mrf.mxu0 }
 0x400   : > { %v2459_v43 = vpop.eup %2458  ;;  %1730 = vst [vmem:[%s3063_s22 + $0x38] sm:$0xff] %v2457_v41  ;;  %2478 = vtanh.f32 %v1626_v40  ;;  %v1628_v44 = vadd.f32 %v1627_v42, %v3050_v53 }
 0x401   : > { %v2461_v45 = vpop.eup %2460  ;;  %1743 = vst [vmem:[%s3063_s22 + $0xa0] sm:$0xff] %v2459_v43  ;;  %v1629_v46 = vpop.f32.mrf.mxu0 }
 0x402   : > { %v2463_v47 = vpop.eup %2462  ;;  %1732 = vst [vmem:[%s3063_s22 + $0x48] sm:$0xff] %v2461_v45  ;;  %2480 = vtanh.f32 %v1628_v44  ;;  %v1630_v48 = vadd.f32 %v1629_v46, %v3044_v51 }
 0x403   : > { %v2465_v49 = vpop.eup %2464  ;;  %1737 = vst [vmem:[%s3063_s22 + $0x70] sm:$0xff] %v2463_v47  ;;  %v1631_v50 = vpop.f32.mrf.mxu0 }
 0x404   : > { %v2467_v52 = vpop.eup %2466  ;;  %1733 = vst [vmem:[%s3063_s22 + $0x50] sm:$0xff] %v2465_v49  ;;  %2482 = vtanh.f32 %v1630_v48  ;;  %v1632_v54 = vadd.f32 %v1631_v50, %v3050_v53 }
 0x405   : > { %v2469_v55 = vpop.eup %2468  ;;  %1746 = vst [vmem:[%s3063_s22 + $0xb8] sm:$0xff] %v2467_v52 }
 0x406   : > { %v2471_v56 = vpop.eup %2470  ;;  %1735 = vst [vmem:[%s3063_s22 + $0x60] sm:$0xff] %v2469_v55  ;;  %2484 = vtanh.f32 %v1632_v54 }
 0x407   : > { %v2473_v51 = vpop.eup %2472  ;;  %1740 = vst [vmem:[%s3063_s22 + $0x88] sm:$0xff] %v2471_v56 }
 0x408   : > { %1736 = vst [vmem:[%s3063_s22 + $0x68] sm:$0xff] %v2473_v51 }
 0x409   : > { %v2475_v57 = vpop.eup %2474 }
 0x40a   : > { %1738 = vst [vmem:[%s3063_s22 + $0x78] sm:$0xff] %v2475_v57 }
 0x40b   : > { %v2477_v34 = vpop.eup %2476 }
 0x40c   : > { %1739 = vst [vmem:[%s3063_s22 + $0x80] sm:$0xff] %v2477_v34 }
 0x40d   : > { %v2479_v58 = vpop.eup %2478 }
 0x40e   : > { %1741 = vst [vmem:[%s3063_s22 + $0x90] sm:$0xff] %v2479_v58 }
 0x40f   : > { %v2481_v16 = vpop.eup %2480 }
 0x410   : > { %1742 = vst [vmem:[%s3063_s22 + $0x98] sm:$0xff] %v2481_v16 }
 0x411   : > { %v2483_v53 = vpop.eup %2482 }
 0x412   : > { %1744 = vst [vmem:[%s3063_s22 + $0xa8] sm:$0xff] %v2483_v53 }
 0x413   : > { %v2485_v59 = vpop.eup %2484 }
 0x414   : > { %1745 = vst [vmem:[%s3063_s22 + $0xb0] sm:$0xff] %v2485_v59 }
 0x415 PF: > { %s27_s17 = sadd.s32 1, %s2746_s17  }
 0x416   : > { %p24_p9 = scmp.ge.s32.totalorder %s27_s17, 4  }
 0x418   :  { %26 = sbr.rel (!%p24_p9) target bundleno = 5 (0x5), region = 139 }
 0x41d   :  { %1787 = vsyncpa [#allocation3], 1 }
 0x41e   :  { %1789 = vsyncpa [#allocation3 + $0x1], 1 }
 0x41f   :  { %1790 = vsyncpa [#allocation5], 1 }
 0x420   :  { %1791 = vsyncpa [#allocation8], 1 }
 0x421   :  { %1792 = vsyncpa [#allocation11], 1 }
 0x422   :  { %1793 = vsyncpa [#allocation14], 1 }

</bundles_post_ra>
